<compile_context>
chip_gen: v7x
topology: tpu7x:2x2x1
jax: 0.10.0
libtpu: 0.0.40
codegen_flags: <defaults>
</compile_context>

<pallas_src>
import functools

import jax
import jax.numpy as jnp
from jax.experimental import pallas as pl
from jax.experimental.pallas import tpu as pltpu


EPS = 1e-8  # torch.nn.functional.cosine_similarity default eps

_WEIGHT_RESIDENT_BUDGET = 16 * 1024 * 1024    # both weight mats, x2 buffering
_PER_ENCODER_TILE_BUDGET = 12 * 1024 * 1024   # double-buffered act(+weight) tiles


def _cdiv(a: int, b: int) -> int:
    return -(-a // b)


def _round_up(x: int, m: int) -> int:
    return _cdiv(x, m) * m


def _maybe_pad2d(x, rows, cols):
    pr, pc = rows - x.shape[0], cols - x.shape[1]
    if pr == 0 and pc == 0:
        return x                      # avoid materializing a no-op pad copy
    return jnp.pad(x, ((0, pr), (0, pc)))


def _choose_batch_tile(B, use_bf16):
    sub = 16 if use_bf16 else 8       # bf16 packs 16 sublanes per vreg
    if B >= 256:
        TB = 128
    elif B >= 2 * sub:
        # >= 2 roughly balanced batch tiles so the "parallel" axis can shard
        # across v7x's two TensorCores (no-op on single-TC v5e/v6e).
        TB = min(128, _round_up(_cdiv(B, 2), sub))
    else:
        TB = _round_up(B, sub)
    return TB, _round_up(B, TB)


def _choose_k_tile(K, TB, D, itemsize, resident_w):
    """Per-encoder K tiling -> (TK, n_k, K_pad)."""
    tk_target = 8192 if itemsize == 2 else 4096
    d_cols = 0 if resident_w else D   # streamed weights ride along each K tile
    cap = _PER_ENCODER_TILE_BUDGET // (2 * itemsize * (TB + d_cols))
    cap = max(128, (cap // 128) * 128)
    tk = min(tk_target, cap)
    if K <= tk:
        return K, 1, K                # single K step, no host padding at all
    n_k = _cdiv(K, tk)
    tk = _round_up(_cdiv(K, n_k), 128)
    n_k = _cdiv(K, tk)
    return tk, n_k, tk * n_k


def _make_kernel(grid_k, resident_w, tk_img, n_k_img, tk_txt, n_k_txt):
    def _accumulate(k, acc_ref, x_ref, w_ref, tk, n_k):
        def _body():
            if resident_w and n_k > 1:
                off = pl.multiple_of(k * tk, tk)
                w = w_ref[pl.ds(off, tk), :]
            else:
                w = w_ref[...]
            acc_ref[...] += jnp.dot(x_ref[...], w,
                                    preferred_element_type=jnp.float32)
        if n_k < grid_k:
            pl.when(k < n_k)(_body)   # skewed-K guard: skip zero-block work
        else:
            _body()

    def kernel(img_ref, w_img_ref, txt_ref, w_txt_ref, sim_ref,
               acc_img_ref, acc_txt_ref):
        k = pl.program_id(1)

        @pl.when(k == 0)
        def _init():
            acc_img_ref[...] = jnp.zeros_like(acc_img_ref)
            acc_txt_ref[...] = jnp.zeros_like(acc_txt_ref)

        _accumulate(k, acc_img_ref, img_ref, w_img_ref, tk_img, n_k_img)
        _accumulate(k, acc_txt_ref, txt_ref, w_txt_ref, tk_txt, n_k_txt)

        @pl.when(k == pl.num_programs(1) - 1)
        def _epilogue():
            fi = acc_img_ref[...]
            ft = acc_txt_ref[...]
            dot = jnp.sum(fi * ft, axis=-1, keepdims=True)
            ni2 = jnp.maximum(jnp.sum(fi * fi, axis=-1, keepdims=True), EPS * EPS)
            nt2 = jnp.maximum(jnp.sum(ft * ft, axis=-1, keepdims=True), EPS * EPS)
            # Two EUP rsqrts (identical to torch's per-norm eps clamp, since
            # sqrt is monotone) instead of rsqrt(ni2*nt2): avoids f32 overflow
            # of the product of squared norms for huge-magnitude features.
            sim_ref[...] = (dot * jax.lax.rsqrt(ni2) * jax.lax.rsqrt(nt2)
                            ).astype(sim_ref.dtype)

    return kernel


@functools.partial(jax.jit, static_argnames=("use_bf16",))
def semantic_matching_forward(image, text, w_img, w_txt, use_bf16=True):
    """image: (B,C,H,W), text: (B,S,Hid), w_img: (C*H*W, D), w_txt: (S*Hid, D)
       -> (B,) f32 cosine similarity between the two encoders' features."""
    B = image.shape[0]
    img_flat = image.reshape(B, -1)        # == torch.flatten(image, 1)
    txt_flat = text.reshape(B, -1)
    K_img, D = w_img.shape
    K_txt, D2 = w_txt.shape
    assert D == D2
    assert img_flat.shape[1] == K_img and txt_flat.shape[1] == K_txt

    stream_dtype = jnp.bfloat16 if use_bf16 else jnp.float32
    itemsize = 2 if use_bf16 else 4

    TB, B_pad = _choose_batch_tile(B, use_bf16)

    # Weights are VMEM-resident (fetched once for the whole grid) when they fit
    # comfortably; otherwise streamed one K tile at a time alongside the acts.
    resident_w = 2 * (K_img + K_txt) * D * itemsize <= _WEIGHT_RESIDENT_BUDGET

    TK_img, n_k_img, K_img_pad = _choose_k_tile(K_img, TB, D, itemsize, resident_w)
    TK_txt, n_k_txt, K_txt_pad = _choose_k_tile(K_txt, TB, D, itemsize, resident_w)
    grid_k = max(n_k_img, n_k_txt)
    grid = (B_pad // TB, grid_k)

    # Zero padding is exact: padded K rows/cols contribute 0 to the matmuls and
    # padded batch rows are sliced away after the kernel.
    img_p = _maybe_pad2d(img_flat.astype(stream_dtype), B_pad, K_img_pad)
    txt_p = _maybe_pad2d(txt_flat.astype(stream_dtype), B_pad, K_txt_pad)
    w_img_p = _maybe_pad2d(w_img.astype(stream_dtype), K_img_pad, D)
    w_txt_p = _maybe_pad2d(w_txt.astype(stream_dtype), K_txt_pad, D)

    def act_spec(tk, n_k):
        if n_k == grid_k:
            return pl.BlockSpec((TB, tk), lambda b, k: (b, k))
        last = n_k - 1   # clamp: repeated block index -> Pallas skips the re-DMA
        return pl.BlockSpec((TB, tk), lambda b, k: (b, jnp.minimum(k, last)))

    def weight_spec(tk, n_k, k_pad):
        if resident_w:
            # Constant block index: the full weight matrix is DMA'd once and
            # stays resident for the whole grid (no per-batch-tile re-stream).
            return pl.BlockSpec((k_pad, D), lambda b, k: (0, 0))
        if n_k == grid_k:
            return pl.BlockSpec((tk, D), lambda b, k: (k, 0))
        last = n_k - 1
        return pl.BlockSpec((tk, D), lambda b, k: (jnp.minimum(k, last), 0))

    # Scoped-VMEM ask = actual need + slack.  The tile/weight budgets above keep
    # this <= ~48 MiB (safe on v7x's 64 MiB/TC) while still exceeding the
    # 16/32 MiB v5e/v6e scoped defaults whenever the bigger tiles want it.
    w_buf_bytes = (2 * (K_img_pad + K_txt_pad) * D * itemsize if resident_w
                   else 2 * (TK_img + TK_txt) * D * itemsize)
    vmem_need = (2 * TB * (TK_img + TK_txt) * itemsize   # double-buffered acts
                 + w_buf_bytes                           # weight buffers
                 + 2 * TB * D * 4                        # f32 accumulators
                 + 2 * TB * 4)                           # similarity output
    vmem_limit = max(32 * 1024 * 1024, _round_up(vmem_need + (4 << 20), 1 << 20))

    kernel = _make_kernel(grid_k, resident_w, TK_img, n_k_img, TK_txt, n_k_txt)

    sim = pl.pallas_call(
        kernel,
        out_shape=jax.ShapeDtypeStruct((B_pad, 1), jnp.float32),
        grid_spec=pltpu.PrefetchScalarGridSpec(
            num_scalar_prefetch=0,
            grid=grid,
            in_specs=[
                act_spec(TK_img, n_k_img),
                weight_spec(TK_img, n_k_img, K_img_pad),
                act_spec(TK_txt, n_k_txt),
                weight_spec(TK_txt, n_k_txt, K_txt_pad),
            ],
            # (TB, 1) output: written once per batch tile at the last K step;
            # output bytes are negligible, so no lane-dense relayout is needed.
            out_specs=pl.BlockSpec((TB, 1), lambda b, k: (b, 0)),
            scratch_shapes=[pltpu.VMEM((TB, D), jnp.float32),
                            pltpu.VMEM((TB, D), jnp.float32)],
        ),
        compiler_params=pltpu.CompilerParams(
            # Batch tiles are independent -> shard across v7x's 2 TensorCores;
            # K is the shared reduction axis, innermost and "arbitrary".
            dimension_semantics=("parallel", "arbitrary"),
            vmem_limit_bytes=int(vmem_limit),
        ),
    )(img_p, w_img_p, txt_p, w_txt_p)

    return sim[:B, 0]


def _reference(image, text, w_img, w_txt):
    B = image.shape[0]
    fi = image.reshape(B, -1) @ w_img
    ft = text.reshape(B, -1) @ w_txt
    ni = jnp.maximum(jnp.linalg.norm(fi, axis=1), EPS)
    nt = jnp.maximum(jnp.linalg.norm(ft, axis=1), EPS)
    return jnp.sum(fi * ft, axis=1) / (ni * nt)


if __name__ == "__main__":
    # Small deterministic shapes consistent with the module's forward:
    #   image: NCHW (B=2, C=4, H=16, W=16); text: (B=2, S=8, Hid=32); D=32.
    B, C, H, W = 2, 4, 16, 16
    S, Hid = 8, 32
    D = 32

    key = jax.random.PRNGKey(0)
    k_img, k_txt, k_wi, k_wt = jax.random.split(key, 4)

    image = jax.random.normal(k_img, (B, C, H, W), dtype=jnp.float32)
    text = jax.random.normal(k_txt, (B, S, Hid), dtype=jnp.float32)

    # Deterministic synthetic encoder parameters (the PyTorch module takes the
    # encoders as injected dependencies; no checkpoint is loaded here).
    # TODO(synk): real image_model/text_model architectures are external deps;
    # they are realized here as flatten -> Linear(K, D) encoders.
    w_img = jax.random.normal(k_wi, (C * H * W, D), dtype=jnp.float32) * 0.02
    w_txt = jax.random.normal(k_wt, (S * Hid, D), dtype=jnp.float32) * 0.02

    ref = _reference(image, text, w_img, w_txt)

    # Default path: bf16-streamed operands, f32 MXU accumulation + f32 epilogue.
    sim = jax.block_until_ready(
        semantic_matching_forward(image, text, w_img, w_txt))
    assert sim.shape == (B,)
    assert jnp.allclose(sim, ref, atol=5e-2), (sim, ref)

    # f32 path (bit-faithful to the module): tight tolerance.
    sim_f32 = jax.block_until_ready(
        semantic_matching_forward(image, text, w_img, w_txt, use_bf16=False))
    assert sim_f32.shape == (B,)
    assert jnp.allclose(sim_f32, ref, atol=1e-5, rtol=1e-5), (sim_f32, ref)

    print("KERNEL_OK")
</pallas_src>

<mosaic_0001>
module attributes {stable_mosaic.version = 11 : i64} {
  func.func @kernel(%arg0: i32, %arg1: i32, %arg2: memref<16x1024xbf16, #tpu.memory_space<vmem>>, %arg3: memref<1024x32xbf16, #tpu.memory_space<vmem>>, %arg4: memref<16x256xbf16, #tpu.memory_space<vmem>>, %arg5: memref<256x32xbf16, #tpu.memory_space<vmem>>, %arg6: memref<16x1xf32, #tpu.memory_space<vmem>>, %arg7: memref<16x32xf32, #tpu.memory_space<vmem>>, %arg8: memref<16x32xf32, #tpu.memory_space<vmem>>) attributes {dimension_semantics = [#tpu.dimension_semantics<parallel>, #tpu.dimension_semantics<arbitrary>], iteration_bounds = array<i64: 1, 1>, scalar_prefetch = 0 : i64, scratch_operands = 2 : i64, tpu.core_type = #tpu.core_type<tc>, window_params = [{transform_indices = @transform_0, window_bounds = array<i64: 16, 1024>}, {pipeline_mode = #tpu.pipeline_mode<synchronous>, transform_indices = @transform_1, window_bounds = array<i64: 1024, 32>}, {transform_indices = @transform_2, window_bounds = array<i64: 16, 256>}, {pipeline_mode = #tpu.pipeline_mode<synchronous>, transform_indices = @transform_3, window_bounds = array<i64: 256, 32>}, {transform_indices = @transform_4, window_bounds = array<i64: 16, 1>}]} {
    %c0_i32 = arith.constant 0 : i32
    %0 = arith.cmpi eq, %arg1, %c0_i32 : i32
    %1 = arith.extui %0 : i1 to i32
    %c0_i32_0 = arith.constant 0 : i32
    %2 = arith.cmpi ne, %1, %c0_i32_0 : i32
    scf.if %2 {
      %cst_19 = arith.constant 0.000000e+00 : f32
      %18 = vector.broadcast %cst_19 : f32 to vector<16x32xf32>
      %c0_20 = arith.constant 0 : index
      %c0_21 = arith.constant 0 : index
      %19 = vector.load %arg7[%c0_20, %c0_21] : memref<16x32xf32, #tpu.memory_space<vmem>>, vector<16x32xf32>
      tpu.vector_store %arg7[%c0_20, %c0_21], %18 {strides = array<i32>} : memref<16x32xf32, #tpu.memory_space<vmem>>, vector<16x32xf32>,
      %cst_22 = arith.constant 0.000000e+00 : f32
      %20 = vector.broadcast %cst_22 : f32 to vector<16x32xf32>
      %c0_23 = arith.constant 0 : index
      %c0_24 = arith.constant 0 : index
      %21 = vector.load %arg8[%c0_23, %c0_24] : memref<16x32xf32, #tpu.memory_space<vmem>>, vector<16x32xf32>
      tpu.vector_store %arg8[%c0_23, %c0_24], %20 {strides = array<i32>} : memref<16x32xf32, #tpu.memory_space<vmem>>, vector<16x32xf32>,
    } else {
    }
    %c0 = arith.constant 0 : index
    %c0_1 = arith.constant 0 : index
    %3 = vector.load %arg3[%c0, %c0_1] : memref<1024x32xbf16, #tpu.memory_space<vmem>>, vector<1024x32xbf16>
    %c0_2 = arith.constant 0 : index
    %c0_3 = arith.constant 0 : index
    %4 = vector.load %arg7[%c0_2, %c0_3] : memref<16x32xf32, #tpu.memory_space<vmem>>, vector<16x32xf32>
    %c0_4 = arith.constant 0 : index
    %c0_5 = arith.constant 0 : index
    %5 = vector.load %arg2[%c0_4, %c0_5] : memref<16x1024xbf16, #tpu.memory_space<vmem>>, vector<16x1024xbf16>
    %cst = arith.constant dense<0.000000e+00> : vector<16x32xf32>
    %6 = tpu.matmul %5, %3, %cst {dimension_numbers = #tpu.dot_dimension_numbers<[1], [0], [0], [1], [0, 0, 1, 1], [], []>} : vector<16x1024xbf16>, vector<1024x32xbf16>, vector<16x32xf32> -> vector<16x32xf32>
    %7 = arith.addf %4, %6 : vector<16x32xf32>
    %c0_6 = arith.constant 0 : index
    %c0_7 = arith.constant 0 : index
    %8 = vector.load %arg7[%c0_6, %c0_7] : memref<16x32xf32, #tpu.memory_space<vmem>>, vector<16x32xf32>
    tpu.vector_store %arg7[%c0_6, %c0_7], %7 {strides = array<i32>} : memref<16x32xf32, #tpu.memory_space<vmem>>, vector<16x32xf32>,
    %c0_8 = arith.constant 0 : index
    %c0_9 = arith.constant 0 : index
    %9 = vector.load %arg5[%c0_8, %c0_9] : memref<256x32xbf16, #tpu.memory_space<vmem>>, vector<256x32xbf16>
    %c0_10 = arith.constant 0 : index
    %c0_11 = arith.constant 0 : index
    %10 = vector.load %arg8[%c0_10, %c0_11] : memref<16x32xf32, #tpu.memory_space<vmem>>, vector<16x32xf32>
    %c0_12 = arith.constant 0 : index
    %c0_13 = arith.constant 0 : index
    %11 = vector.load %arg4[%c0_12, %c0_13] : memref<16x256xbf16, #tpu.memory_space<vmem>>, vector<16x256xbf16>
    %cst_14 = arith.constant dense<0.000000e+00> : vector<16x32xf32>
    %12 = tpu.matmul %11, %9, %cst_14 {dimension_numbers = #tpu.dot_dimension_numbers<[1], [0], [0], [1], [0, 0, 1, 1], [], []>} : vector<16x256xbf16>, vector<256x32xbf16>, vector<16x32xf32> -> vector<16x32xf32>
    %13 = arith.addf %10, %12 : vector<16x32xf32>
    %c0_15 = arith.constant 0 : index
    %c0_16 = arith.constant 0 : index
    %14 = vector.load %arg8[%c0_15, %c0_16] : memref<16x32xf32, #tpu.memory_space<vmem>>, vector<16x32xf32>
    tpu.vector_store %arg8[%c0_15, %c0_16], %13 {strides = array<i32>} : memref<16x32xf32, #tpu.memory_space<vmem>>, vector<16x32xf32>,
    %c0_i32_17 = arith.constant 0 : i32
    %15 = arith.cmpi eq, %arg1, %c0_i32_17 : i32
    %16 = arith.extui %15 : i1 to i32
    %c0_i32_18 = arith.constant 0 : i32
    %17 = arith.cmpi ne, %16, %c0_i32_18 : i32
    scf.if %17 {
      %c0_19 = arith.constant 0 : index
      %c0_20 = arith.constant 0 : index
      %18 = vector.load %arg7[%c0_19, %c0_20] : memref<16x32xf32, #tpu.memory_space<vmem>>, vector<16x32xf32>
      %c0_21 = arith.constant 0 : index
      %c0_22 = arith.constant 0 : index
      %19 = vector.load %arg8[%c0_21, %c0_22] : memref<16x32xf32, #tpu.memory_space<vmem>>, vector<16x32xf32>
      %20 = arith.mulf %18, %19 : vector<16x32xf32>
      %cst_23 = arith.constant dense<0.000000e+00> : vector<16xf32>
      %21 = vector.multi_reduction <add>, %20, %cst_23 [1] : vector<16x32xf32> to vector<16xf32>
      %22 = vector.shape_cast %21 : vector<16xf32> to vector<16x1xf32>
      %23 = arith.mulf %18, %18 : vector<16x32xf32>
      %cst_24 = arith.constant dense<0.000000e+00> : vector<16xf32>
      %24 = vector.multi_reduction <add>, %23, %cst_24 [1] : vector<16x32xf32> to vector<16xf32>
      %25 = vector.shape_cast %24 : vector<16xf32> to vector<16x1xf32>
      %cst_25 = arith.constant 1.000000e-16 : f32
      %26 = vector.broadcast %cst_25 : f32 to vector<16x1xf32>
      %27 = arith.maximumf %25, %26 : vector<16x1xf32>
      %28 = arith.mulf %19, %19 : vector<16x32xf32>
      %cst_26 = arith.constant dense<0.000000e+00> : vector<16xf32>
      %29 = vector.multi_reduction <add>, %28, %cst_26 [1] : vector<16x32xf32> to vector<16xf32>
      %30 = vector.shape_cast %29 : vector<16xf32> to vector<16x1xf32>
      %cst_27 = arith.constant 1.000000e-16 : f32
      %31 = vector.broadcast %cst_27 : f32 to vector<16x1xf32>
      %32 = arith.maximumf %30, %31 : vector<16x1xf32>
      %33 = math.rsqrt %27 : vector<16x1xf32>
      %34 = arith.mulf %22, %33 : vector<16x1xf32>
      %35 = math.rsqrt %32 : vector<16x1xf32>
      %36 = arith.mulf %34, %35 : vector<16x1xf32>
      %c0_28 = arith.constant 0 : index
      %c0_29 = arith.constant 0 : index
      %37 = vector.load %arg6[%c0_28, %c0_29] : memref<16x1xf32, #tpu.memory_space<vmem>>, vector<16x1xf32>
      tpu.vector_store %arg6[%c0_28, %c0_29], %36 {strides = array<i32>} : memref<16x1xf32, #tpu.memory_space<vmem>>, vector<16x1xf32>,
    } else {
    }
    return
  }
  func.func @transform_0(%arg0: i32, %arg1: i32) -> (i32, i32) {
    %c0_i32 = arith.constant 0 : i32
    return %arg0, %arg1 : i32, i32
  }
  func.func @transform_1(%arg0: i32, %arg1: i32) -> (i32, i32) {
    %c0_i32 = arith.constant 0 : i32
    %c0_i32_0 = arith.constant 0 : i32
    %c0_i32_1 = arith.constant 0 : i32
    return %c0_i32, %c0_i32_0 : i32, i32
  }
  func.func @transform_2(%arg0: i32, %arg1: i32) -> (i32, i32) {
    %c0_i32 = arith.constant 0 : i32
    return %arg0, %arg1 : i32, i32
  }
  func.func @transform_3(%arg0: i32, %arg1: i32) -> (i32, i32) {
    %c0_i32 = arith.constant 0 : i32
    %c0_i32_0 = arith.constant 0 : i32
    %c0_i32_1 = arith.constant 0 : i32
    return %c0_i32, %c0_i32_0 : i32, i32
  }
  func.func @transform_4(%arg0: i32, %arg1: i32) -> (i32, i32) {
    %c0_i32 = arith.constant 0 : i32
    %c0_i32_0 = arith.constant 0 : i32
    return %arg0, %c0_i32 : i32, i32
  }
}

</mosaic_0001>

<bundles_post_ra>
// kernel: semantic_matching_forward.1
= control target key start
LH: loop header
LB: loop body
LE: loop exit
PB: predicated region body
PF: predicated region fallthrough
CT: control target
= control target key end

     0   :  { %vm22_vm0 = vcmask 261120   ;;  %vm988_vm1 = vcmask 7168   ;;  %s1603_s1 = inlined_call_operand.vmem [shape: bf16[1024,32], index: 1, kind: input, shape index: {}]   ;;  %s1604_s0 = inlined_call_operand.vmem [shape: bf16[16,1024], index: 0, kind: input, shape index: {}]   ;;  %s1605_s3 = inlined_call_operand.vmem [shape: bf16[256,32], index: 3, kind: input, shape index: {}]   ;;  %s1606_s2 = inlined_call_operand.vmem [shape: bf16[16,256], index: 2, kind: input, shape index: {}]   ;;  %s1607_s4 = inlined_call_operand.vmem [shape: f32[16,1], index: 4, kind: output, shape index: {}]  }
   0x1   :  { %v1196_v0 = vld [vmem:[%s1603_s1 + $0x40] sm:$0xff]   ;;  %v1200_v4 = vld [vmem:[%s1603_s1 + $0x48] sm:$0xff]   ;;  %v1204_v8 = vld [vmem:[%s1603_s1 + $0x50] sm:$0xff]  }
   0x2   :  { %v1197_v1 = vld [vmem:[%s1603_s1 + $0xc0] sm:$0xff]   ;;  %1085 = vmatprep.subr.bf16.mxu0 %v1196_v0  ;;  %v1201_v5 = vld [vmem:[%s1603_s1 + $0xc8] sm:$0xff]   ;;  %v1205_v9 = vld [vmem:[%s1603_s1 + $0xd0] sm:$0xff]  }
   0x3   :  { %v1198_v2 = vld [vmem:[%s1603_s1] sm:$0xff]   ;;  %1107 = vmatprep.subr.bf16.mxu1 %v1197_v1  ;;  %v1202_v6 = vld [vmem:[%s1603_s1 + $0x8] sm:$0xff]   ;;  %v1206_v10 = vld [vmem:[%s1603_s1 + $0x10] sm:$0xff]  }
   0x4   :  { %v1199_v3 = vld [vmem:[%s1603_s1 + $0x80] sm:$0xff]   ;;  %1086 = vmatpush3.bf16.msra.mxu0 %v1198_v2  ;;  %v1203_v7 = vld [vmem:[%s1603_s1 + $0x88] sm:$0xff]   ;;  %v1207_v11 = vld [vmem:[%s1603_s1 + $0x90] sm:$0xff]  }
   0x5   :  { %1108 = vmatpush3.bf16.msra.mxu1 %v1199_v3  ;;  %1087 = vmatprep.subr.bf16.mxu0 %v1200_v4  ;;  %v1208_v12 = vld [vmem:[%s1603_s1 + $0x58] sm:$0xff]   ;;  %v1212_v16 = vld [vmem:[%s1603_s1 + $0x60] sm:$0xff]   ;;  %v1216_v20 = vld [vmem:[%s1603_s1 + $0x68] sm:$0xff]  }
   0x6   :  { %1109 = vmatprep.subr.bf16.mxu1 %v1201_v5  ;;  %v1209_v13 = vld [vmem:[%s1603_s1 + $0xd8] sm:$0xff]   ;;  %v1213_v17 = vld [vmem:[%s1603_s1 + $0xe0] sm:$0xff]   ;;  %v1217_v21 = vld [vmem:[%s1603_s1 + $0xe8] sm:$0xff]  }
   0x7   :  { %v1210_v14 = vld [vmem:[%s1603_s1 + $0x18] sm:$0xff]   ;;  %v1214_v18 = vld [vmem:[%s1603_s1 + $0x20] sm:$0xff]   ;;  %v1218_v22 = vld [vmem:[%s1603_s1 + $0x28] sm:$0xff]  }
   0x8   :  { %1088 = vmatpush3.bf16.msra.mxu0 %v1202_v6  ;;  %v1211_v15 = vld [vmem:[%s1603_s1 + $0x98] sm:$0xff]   ;;  %v1215_v19 = vld [vmem:[%s1603_s1 + $0xa0] sm:$0xff]   ;;  %v1219_v23 = vld [vmem:[%s1603_s1 + $0xa8] sm:$0xff]  }
   0x9   :  { %1110 = vmatpush3.bf16.msra.mxu1 %v1203_v7  ;;  %1089 = vmatprep.subr.bf16.mxu0 %v1204_v8  ;;  %v1220_v24 = vld [vmem:[%s1603_s1 + $0x70] sm:$0xff]   ;;  %v1224_v28 = vld [vmem:[%s1603_s1 + $0x78] sm:$0xff]   ;;  %v157_v32 = vld [vmem:[%s1604_s0] sm:$0xff] }
   0xa   :  { %1111 = vmatprep.subr.bf16.mxu1 %v1205_v9  ;;  %v1221_v25 = vld [vmem:[%s1603_s1 + $0xf0] sm:$0xff]   ;;  %v1225_v29 = vld [vmem:[%s1603_s1 + $0xf8] sm:$0xff]   ;;  %v161_v33 = vld [vmem:[%s1604_s0 + $0x20] sm:$0xff] }
   0xb   :  { %v1222_v26 = vld [vmem:[%s1603_s1 + $0x30] sm:$0xff]   ;;  %v1226_v30 = vld [vmem:[%s1603_s1 + $0x38] sm:$0xff]   ;;  %v158_v34 = vld [vmem:[%s1604_s0 + $0x8] sm:$0xff]  ;;  %v995_v35 = vcombine.low %v157_v32, %v161_v33  ;;  %v996_v36 = vcombine.high %v157_v32, %v161_v33 }
   0xc   :  { %1090 = vmatpush3.bf16.msra.mxu0 %v1206_v10  ;;  %v1223_v27 = vld [vmem:[%s1603_s1 + $0xb0] sm:$0xff]   ;;  %v1227_v31 = vld [vmem:[%s1603_s1 + $0xb8] sm:$0xff]   ;;  %v162_v37 = vld [vmem:[%s1604_s0 + $0x28] sm:$0xff] }
   0xd   :  { %1112 = vmatpush3.bf16.msra.mxu1 %v1207_v11  ;;  %1091 = vmatprep.subr.bf16.mxu0 %v1208_v12  ;;  %v997_v38 = vcombine.low %v158_v34, %v162_v37  ;;  %v998_v39 = vcombine.high %v158_v34, %v162_v37  ;;  %v1228_v40 = vld [vmem:[%s1603_s1 + $0x140] sm:$0xff]   ;;  %v1232_v44 = vld [vmem:[%s1603_s1 + $0x148] sm:$0xff]   ;;  %v1236_v48 = vld [vmem:[%s1603_s1 + $0x150] sm:$0xff]   ;;  %v1287_v34 = vmov 0.0  }
   0xe   :  { %1113 = vmatprep.subr.bf16.mxu1 %v1209_v13  ;;  %621 = vmatprep.mubr.bf16.mxu0 %v996_v36  ;;  %v1229_v41 = vld [vmem:[%s1603_s1 + $0x100] sm:$0xff]   ;;  %v1233_v45 = vld [vmem:[%s1603_s1 + $0x108] sm:$0xff]   ;;  %v1237_v49 = vld [vmem:[%s1603_s1 + $0x110] sm:$0xff]   ;;  %23 = vst.msk [vmem:[#allocation2] sm:$0xff] %vm22_vm0, %v1287_v34 }
   0xf   :  { %662 = vmatprep.mubr.bf16.mxu1 %v998_v39  ;;  %v1230_v42 = vld [vmem:[%s1603_s1 + $0x1c0] sm:$0xff]   ;;  %v1234_v46 = vld [vmem:[%s1603_s1 + $0x1c8] sm:$0xff]   ;;  %v1238_v50 = vld [vmem:[%s1603_s1 + $0x1d0] sm:$0xff]   ;;  %24 = vst.msk [vmem:[#allocation2 + $0x8] sm:$0xff] %vm22_vm0, %v1287_v34 }
  0x10   :  { %1092 = vmatpush3.bf16.msra.mxu0 %v1210_v14  ;;  %v1231_v43 = vld [vmem:[%s1603_s1 + $0x180] sm:$0xff]   ;;  %v1235_v47 = vld [vmem:[%s1603_s1 + $0x188] sm:$0xff]   ;;  %v1239_v51 = vld [vmem:[%s1603_s1 + $0x190] sm:$0xff]   ;;  %25 = vst.msk [vmem:[#allocation3] sm:$0xff] %vm22_vm0, %v1287_v34 }
  0x11   :  { %1114 = vmatpush3.bf16.msra.mxu1 %v1211_v15  ;;  %1093 = vmatprep.subr.bf16.mxu0 %v1212_v16  ;;  %v1240_v52 = vld [vmem:[%s1603_s1 + $0x158] sm:$0xff]   ;;  %v1244_v56 = vld [vmem:[%s1603_s1 + $0x160] sm:$0xff]   ;;  %v1248_v60 = vld [vmem:[%s1603_s1 + $0x168] sm:$0xff]   ;;  %26 = vst.msk [vmem:[#allocation3 + $0x8] sm:$0xff] %vm22_vm0, %v1287_v34 }
  0x12   :  { %1115 = vmatprep.subr.bf16.mxu1 %v1213_v17  ;;  %v1241_v53 = vld [vmem:[%s1603_s1 + $0x118] sm:$0xff]   ;;  %v1245_v57 = vld [vmem:[%s1603_s1 + $0x120] sm:$0xff]   ;;  %v1249_v61 = vld [vmem:[%s1603_s1 + $0x128] sm:$0xff]  }
  0x13   :  { %v1242_v54 = vld [vmem:[%s1603_s1 + $0x1d8] sm:$0xff]   ;;  %v1246_v58 = vld [vmem:[%s1603_s1 + $0x1e0] sm:$0xff]   ;;  %v1250_v62 = vld [vmem:[%s1603_s1 + $0x1e8] sm:$0xff]  }
  0x14   :  { %1094 = vmatpush3.bf16.msra.mxu0 %v1214_v18  ;;  %v1243_v55 = vld [vmem:[%s1603_s1 + $0x198] sm:$0xff]   ;;  %v1247_v59 = vld [vmem:[%s1603_s1 + $0x1a0] sm:$0xff]   ;;  %v1251_v63 = vld [vmem:[%s1603_s1 + $0x1a8] sm:$0xff]  }
  0x15   :  { %1116 = vmatpush3.bf16.msra.mxu1 %v1215_v19  ;;  %1095 = vmatprep.subr.bf16.mxu0 %v1216_v20  ;;  %v1252_v0 = vld [vmem:[%s1603_s1 + $0x170] sm:$0xff]   ;;  %v1256_v4 = vld [vmem:[%s1603_s1 + $0x178] sm:$0xff]   ;;  %v1260_v12 = vld [vmem:[%s1605_s3 + $0x40] sm:$0xff]  }
  0x16   :  { %1117 = vmatprep.subr.bf16.mxu1 %v1217_v21  ;;  %v1253_v1 = vld [vmem:[%s1603_s1 + $0x130] sm:$0xff]   ;;  %v1257_v5 = vld [vmem:[%s1603_s1 + $0x138] sm:$0xff]   ;;  %v1261_v17 = vld [vmem:[%s1605_s3] sm:$0xff]  }
  0x17   :  { %v1254_v2 = vld [vmem:[%s1603_s1 + $0x1f0] sm:$0xff]   ;;  %v1258_v6 = vld [vmem:[%s1603_s1 + $0x1f8] sm:$0xff]   ;;  %v1262_v18 = vld [vmem:[%s1605_s3 + $0x48] sm:$0xff]  }
  0x18   :  { %1096 = vmatpush3.bf16.msra.mxu0 %v1218_v22  ;;  %v1255_v3 = vld [vmem:[%s1603_s1 + $0x1b0] sm:$0xff]   ;;  %v1259_v11 = vld [vmem:[%s1603_s1 + $0x1b8] sm:$0xff]   ;;  %v1263_v19 = vld [vmem:[%s1605_s3 + $0x8] sm:$0xff]  }
  0x19   :  { %1118 = vmatpush3.bf16.msra.mxu1 %v1219_v23  ;;  %1097 = vmatprep.subr.bf16.mxu0 %v1220_v24  ;;  %v159_v7 = vld [vmem:[%s1604_s0 + $0x10] sm:$0xff]  ;;  %v160_v13 = vld [vmem:[%s1604_s0 + $0x18] sm:$0xff]  ;;  %v1268_v24 = vld [vmem:[%s1605_s3 + $0x60] sm:$0xff]  }
  0x1a   :  { %1119 = vmatprep.subr.bf16.mxu1 %v1221_v25  ;;  %v163_v8 = vld [vmem:[%s1604_s0 + $0x30] sm:$0xff]  ;;  %v164_v14 = vld [vmem:[%s1604_s0 + $0x38] sm:$0xff]  ;;  %v1269_v25 = vld [vmem:[%s1605_s3 + $0x20] sm:$0xff]  }
  0x1b   :  { %v999_v9 = vcombine.low %v159_v7, %v163_v8  ;;  %v1000_v10 = vcombine.high %v159_v7, %v163_v8  ;;  %v1001_v15 = vcombine.low %v160_v13, %v164_v14  ;;  %v1002_v16 = vcombine.high %v160_v13, %v164_v14  ;;  %v1264_v20 = vld [vmem:[%s1605_s3 + $0x50] sm:$0xff]   ;;  %v1266_v22 = vld [vmem:[%s1605_s3 + $0x58] sm:$0xff]   ;;  %v1276_v33 = vld [vmem:[%s1606_s2] ss:$8 sps:$4 sm:$0xff]  }
  0x1c   :  { %1098 = vmatpush3.bf16.msra.mxu0 %v1222_v26  ;;  %v1265_v21 = vld [vmem:[%s1605_s3 + $0x10] sm:$0xff]   ;;  %v1267_v23 = vld [vmem:[%s1605_s3 + $0x18] sm:$0xff]   ;;  %v1270_v26 = vld [vmem:[%s1605_s3 + $0x68] sm:$0xff]  }
  0x1d   :  { %1120 = vmatpush3.bf16.msra.mxu1 %v1223_v27  ;;  %1099 = vmatprep.subr.bf16.mxu0 %v1224_v28  ;;  %v1278_v27 = vld [vmem:[%s1606_s2 + $0x4] ss:$8 sps:$4 sm:$0xff]   ;;  %v1275_v32 = vld [vmem:[%s1605_s3 + $0x38] sm:$0xff]  }
  0x1e   :  { %1121 = vmatprep.subr.bf16.mxu1 %v1225_v29  ;;  %v1271_v28 = vld [vmem:[%s1605_s3 + $0x28] sm:$0xff]   ;;  %v1272_v29 = vld [vmem:[%s1605_s3 + $0x70] sm:$0xff]  }
  0x20   :  { %1100 = vmatpush3.bf16.msra.mxu0 %v1226_v30  ;;  %v1273_v30 = vld [vmem:[%s1605_s3 + $0x30] sm:$0xff]  }
  0x21   :  { %1122 = vmatpush3.bf16.msra.mxu1 %v1227_v31  ;;  %1129 = vmatprep.subr.bf16.mxu0 %v1228_v40  ;;  %v1274_v31 = vld [vmem:[%s1605_s3 + $0x78] sm:$0xff]  }
  0x22   :  { %1151 = vmatprep.subr.bf16.mxu1 %v1230_v42 }
  0x23   :  { %622 = vmatmul.mubr.bf16.vlgmr.msra.gmra.mrb[0].mxu0 %v995_v35 }
  0x24   :  { %663 = vmatmul.mubr.bf16.vlgmr.msra.gmra.mrb[0].mxu1 %v997_v38  ;;  %1130 = vmatpush3.bf16.msra.mxu0 %v1229_v41 }
  0x25   :  { %1152 = vmatpush3.bf16.msra.mxu1 %v1231_v43  ;;  %1131 = vmatprep.subr.bf16.mxu0 %v1232_v44 }
  0x26   :  { %1153 = vmatprep.subr.bf16.mxu1 %v1234_v46  ;;  %703 = vmatprep.mubr.bf16.mxu0 %v1000_v10 }
  0x27   :  { %744 = vmatprep.mubr.bf16.mxu1 %v1002_v16  ;;  %v791_v16 = vld [vmem:[#allocation3 + $0x8] sm:$0xff] }
  0x28   :  { %1132 = vmatpush3.bf16.msra.mxu0 %v1233_v45 }
  0x29   :  { %1154 = vmatpush3.bf16.msra.mxu1 %v1235_v47  ;;  %1133 = vmatprep.subr.bf16.mxu0 %v1236_v48 }
  0x2a   :  { %1155 = vmatprep.subr.bf16.mxu1 %v1238_v50 }
  0x2c   :  { %1134 = vmatpush3.bf16.msra.mxu0 %v1237_v49 }
  0x2d   :  { %1156 = vmatpush3.bf16.msra.mxu1 %v1239_v51  ;;  %1135 = vmatprep.subr.bf16.mxu0 %v1240_v52 }
  0x2e   :  { %1157 = vmatprep.subr.bf16.mxu1 %v1242_v54 }
  0x30   :  { %1136 = vmatpush3.bf16.msra.mxu0 %v1241_v53 }
  0x31   :  { %1158 = vmatpush3.bf16.msra.mxu1 %v1243_v55  ;;  %1137 = vmatprep.subr.bf16.mxu0 %v1244_v56 }
  0x32   :  { %1159 = vmatprep.subr.bf16.mxu1 %v1246_v58 }
  0x34   :  { %1138 = vmatpush3.bf16.msra.mxu0 %v1245_v57 }
  0x35   :  { %1160 = vmatpush3.bf16.msra.mxu1 %v1247_v59  ;;  %1139 = vmatprep.subr.bf16.mxu0 %v1248_v60  ;;  %v155_v60 = vld [vmem:[#allocation2] sm:$0xff] }
  0x36   :  { %1161 = vmatprep.subr.bf16.mxu1 %v1250_v62 }
  0x38   :  { %1140 = vmatpush3.bf16.msra.mxu0 %v1249_v61 }
  0x39   :  { %1162 = vmatpush3.bf16.msra.mxu1 %v1251_v63  ;;  %1141 = vmatprep.subr.bf16.mxu0 %v1252_v0 }
  0x3a   :  { %1163 = vmatprep.subr.bf16.mxu1 %v1254_v2 }
  0x3c   :  { %1142 = vmatpush3.bf16.msra.mxu0 %v1253_v1  ;;  %v156_v1 = vld [vmem:[#allocation2 + $0x8] sm:$0xff] }
  0x3d   :  { %1164 = vmatpush3.bf16.msra.mxu1 %v1255_v3  ;;  %1143 = vmatprep.subr.bf16.mxu0 %v1256_v4 }
  0x3e   :  { %1165 = vmatprep.subr.bf16.mxu1 %v1258_v6 }
  0x40   :  { %1144 = vmatpush3.bf16.msra.mxu0 %v1257_v5 }
  0x41   :  { %1166 = vmatpush3.bf16.msra.mxu1 %v1259_v11  ;;  %1173 = vmatprep.subr.bf16.mxu0 %v1260_v12  ;;  %v790_v12 = vld [vmem:[#allocation3] sm:$0xff] }
  0x43   :  { %704 = vmatmul.mubr.bf16.vlgmr.msra.gmra.mrb[4].mxu0 %v999_v9 }
  0x44   :  { %1174 = vmatpush3.bf16.msra.mxu0 %v1261_v17  ;;  %745 = vmatmul.mubr.bf16.vlgmr.msra.gmra.mrb[4].mxu1 %v1001_v15 }
  0x45   :  { %1175 = vmatprep.subr.bf16.mxu0 %v1262_v18  ;;  %932 = vmatprep.mubr.bf16.mxu0 %v1278_v27 }
  0x48   :  { %1176 = vmatpush3.bf16.msra.mxu0 %v1263_v19 }
  0x49   :  { %1177 = vmatprep.subr.bf16.mxu0 %v1264_v20 }
  0x4c   :  { %1178 = vmatpush3.bf16.msra.mxu0 %v1265_v21 }
  0x4d   :  { %1179 = vmatprep.subr.bf16.mxu0 %v1266_v22 }
  0x50   :  { %1180 = vmatpush3.bf16.msra.mxu0 %v1267_v23 }
  0x51   :  { %1181 = vmatprep.subr.bf16.mxu0 %v1268_v24 }
  0x54   :  { %1182 = vmatpush3.bf16.msra.mxu0 %v1269_v25 }
  0x55   :  { %1183 = vmatprep.subr.bf16.mxu0 %v1270_v26 }
  0x58   :  { %1184 = vmatpush3.bf16.msra.mxu0 %v1271_v28 }
  0x59   :  { %1185 = vmatprep.subr.bf16.mxu0 %v1272_v29 }
  0x5c   :  { %1186 = vmatpush3.bf16.msra.mxu0 %v1273_v30 }
  0x5d   :  { %1187 = vmatprep.subr.bf16.mxu0 %v1274_v31 }
  0x60   :  { %1188 = vmatpush3.bf16.msra.mxu0 %v1275_v32 }
  0x63   :  { %933 = vmatmul.mubr.bf16.vlgmr.msra.gmra.mrb[8].mxu0 %v1276_v33 }
  0xf6   :  { %v1101_v35 = vpop.f32.mrb[0].mxu0 }
  0xf7   :  { %v1123_v36 = vpop.f32.mrb[0].mxu1  ;;  %v1102_v37 = vpop.f32.mrb[1].mxu0 }
  0xf8   :  { %v1103_v38 = vadd.f32 %v1102_v37, %v1101_v35  ;;  %v1124_v39 = vpop.f32.mrb[1].mxu1  ;;  %v1104_v40 = vpop.f32.mrb[2].mxu0 }
  0xf9   :  { %v1125_v41 = vadd.f32 %v1124_v39, %v1123_v36  ;;  %v1126_v42 = vpop.f32.mrb[2].mxu1  ;;  %v1105_v43 = vpop.f32.mrb[3].mxu0 }
  0xfa   :  { %v1106_v44 = vadd.f32 %v1105_v43, %v1104_v40  ;;  %v1127_v45 = vpop.f32.mrb[3].mxu1 }
  0xfb   :  { %v665_v46 = vadd.f32 %v1125_v41, %v1103_v38  ;;  %v1128_v47 = vadd.f32 %v1127_v45, %v1126_v42 }
  0xfd   :  { %v668_v48 = vadd.f32 %v1128_v47, %v1106_v44 }
 0x116   :  { %v1145_v49 = vpop.f32.mrb[4].mxu0 }
 0x117   :  { %v1146_v50 = vpop.f32.mrb[5].mxu0  ;;  %v1167_v53 = vpop.f32.mrb[4].mxu1 }
 0x118   :  { %v1147_v51 = vadd.f32 %v1146_v50, %v1145_v49  ;;  %v1148_v52 = vpop.f32.mrb[6].mxu0  ;;  %v1168_v55 = vpop.f32.mrb[5].mxu1 }
 0x119   :  { %v1149_v54 = vpop.f32.mrb[7].mxu0  ;;  %v1169_v58 = vadd.f32 %v1168_v55, %v1167_v53  ;;  %v1170_v59 = vpop.f32.mrb[6].mxu1 }
 0x11a   :  { %v706_v56 = vadd.f32 %v1147_v51, %v665_v46  ;;  %v1150_v57 = vadd.f32 %v1149_v54, %v1148_v52  ;;  %v1171_v61 = vpop.f32.mrb[7].mxu1 }
 0x11b   :  { %v1172_v0 = vadd.f32 %v1171_v61, %v1170_v59 }
 0x11c   :  { %v709_v62 = vadd.f32 %v1150_v57, %v668_v48  ;;  %v747_v63 = vadd.f32 %v1169_v58, %v706_v56 }
 0x11e   :  { %v753_v2 = vadd.f32 %v747_v63, %v155_v60  ;;  %v750_v3 = vadd.f32 %v1172_v0, %v709_v62 }
 0x120   :  { %756 = vst.msk [vmem:[#allocation2] sm:$0xff] %vm22_vm0, %v753_v2  ;;  %v754_v4 = vadd.f32 %v750_v3, %v156_v1 }
 0x122   :  { %757 = vst.msk [vmem:[#allocation2 + $0x8] sm:$0xff] %vm22_vm0, %v754_v4 }
 0x127   :  { %v948_v5 = vld [vmem:[#allocation2] sm:$0xff] }
 0x128   :  { %v960_v6 = vmul.f32 %v948_v5, %v948_v5 }
 0x129   :  { %v949_v7 = vld [vmem:[#allocation2 + $0x8] sm:$0xff] }
 0x12a   :  { %v962_v8 = vsel %vm22_vm0, %v960_v6, 0.0  ;;  %v961_v9 = vmul.f32 %v949_v7, %v949_v7 }
 0x12b   :  { %963 = vadd.xlane.f32.xlu0 %v962_v8 }
 0x12c   :  { %v965_v10 = vsel %vm22_vm0, %v961_v9, 0.0 }
 0x12f   :  { %966 = vadd.xlane.f32.xlu0 %v965_v10 }
 0x136   :  { %v1189_v11 = vpop.f32.mrb[8].mxu0 }
 0x137   :  { %v1190_v13 = vpop.f32.mrb[9].mxu0 }
 0x138   :  { %v1191_v14 = vadd.f32 %v1190_v13, %v1189_v11  ;;  %v1192_v15 = vpop.f32.mrb[10].mxu0 }
 0x139   :  { %v1193_v17 = vpop.f32.mrb[11].mxu0 }
 0x13a   :  { %v941_v18 = vadd.f32 %v1191_v14, %v790_v12  ;;  %v1194_v19 = vadd.f32 %v1193_v17, %v1192_v15 }
 0x13c   :  { %943 = vst.msk [vmem:[#allocation3] sm:$0xff] %vm22_vm0, %v941_v18  ;;  %v942_v20 = vadd.f32 %v1194_v19, %v791_v16 }
 0x13e   :  { %944 = vst.msk [vmem:[#allocation3 + $0x8] sm:$0xff] %vm22_vm0, %v942_v20 }
 0x143   :  { %v950_v21 = vld [vmem:[#allocation3] sm:$0xff] }
 0x144   :  { %v970_v22 = vmul.f32 %v950_v21, %v950_v21  ;;  %v952_v23 = vmul.f32 %v950_v21, %v948_v5 }
 0x145   :  { %v951_v24 = vld [vmem:[#allocation3 + $0x8] sm:$0xff] }
 0x146   :  { %v972_v25 = vsel %vm22_vm0, %v970_v22, 0.0  ;;  %v954_v26 = vsel %vm22_vm0, %v952_v23, 0.0  ;;  %v971_v27 = vmul.f32 %v951_v24, %v951_v24  ;;  %v953_v29 = vmul.f32 %v951_v24, %v949_v7 }
 0x147   :  { %973 = vadd.xlane.f32.xlu1 %v972_v25  ;;  %955 = vadd.xlane.f32.xlu0 %v954_v26 }
 0x148   :  { %v975_v28 = vsel %vm22_vm0, %v971_v27, 0.0  ;;  %v957_v30 = vsel %vm22_vm0, %v953_v29, 0.0 }
 0x14b   :  { %976 = vadd.xlane.f32.xlu1 %v975_v28 }
 0x14f   :  { %958 = vadd.xlane.f32.xlu1 %v957_v30 }
 0x1b8   :  { %v964_v31 = vpop.xlane.xlu0 %963 }
 0x1b9   :  { %v968_v32 = vmax.f32 %v964_v31, 1e-16 }
 0x1bb   :  { %1279 = vrsqrt.f32 %v968_v32 }
 0x1bc   :  { %v967_v33 = vpop.xlane.xlu0 %966 }
 0x1bd   :  { %v969_v35 = vmax.f32 %v967_v33, 1e-16 }
 0x1c5   :  { %v1280_v40 = vpop.eup %1279 }
 0x1d4   :  { %v974_v34 = vpop.xlane.xlu1 %973  ;;  %v956_v39 = vpop.xlane.xlu0 %955 }
 0x1d5   :  { %v978_v36 = vmax.f32 %v974_v34, 1e-16  ;;  %v982_v41 = vmul.f32 %v1280_v40, %v956_v39 }
 0x1d7   :  { %1281 = vrsqrt.f32 %v978_v36 }
 0x1d8   :  { %v977_v37 = vpop.xlane.xlu1 %976  ;;  %1283 = vrsqrt.f32 %v969_v35 }
 0x1d9   :  { %v979_v38 = vmax.f32 %v977_v37, 1e-16 }
 0x1db   :  { %1285 = vrsqrt.f32 %v979_v38 }
 0x1dc   :  { %v959_v43 = vpop.xlane.xlu1 %958 }
 0x1e1   :  { %v1282_v42 = vpop.eup %1281 }
 0x1e2   :  { %v986_v44 = vmul.f32 %v1282_v42, %v982_v41  ;;  %v1284_v45 = vpop.eup %1283 }
 0x1e3   :  { %v983_v46 = vmul.f32 %v1284_v45, %v959_v43 }
 0x1e4   :  { %989 = vst.msk [vmem:[%s1607_s4] sm:$0xff] %vm988_vm1, %v986_v44 }
 0x1e5   :  { %v1286_v47 = vpop.eup %1285 }
 0x1e6   :  { %v987_v48 = vmul.f32 %v1286_v47, %v983_v46 }
 0x1e8   :  { %990 = vst.msk [vmem:[%s1607_s4 + $0x8] sm:$0xff] %vm988_vm1, %v987_v48 }

</bundles_post_ra>
